<compile_context>
chip_gen: v7x
topology: tpu7x:2x2x1
jax: 0.10.0
libtpu: 0.0.40
codegen_flags: <defaults>
</compile_context>

<pallas_src>
import functools

import jax
import jax.numpy as jnp
from jax.experimental import pallas as pl
from jax.experimental.pallas import tpu as pltpu


_VMEM_BUDGET = 40 * 2 ** 20      # per-kernel working-set target (v7x-safe)
_TB_CANDIDATES = (512, 256, 128, 64, 32, 16, 8)


def _round_up(x, m):
    return (x + m - 1) // m * m


def _pick_tn(H, max_tn=512):
    """Hidden-tile width: largest of {512,256,128} dividing the padded H."""
    Hp = _round_up(H, 128)
    for tn in (512, 256, 128):
        if tn <= max_tn and Hp % tn == 0:
            return Hp, tn
    return Hp, 128


def _pick_batch_tiling(B, max_tb):
    """(Bp, TB) with padding waste beyond sublane alignment kept <= ~12.5%."""
    max_tb = max(8, (max_tb // 8) * 8)
    B8 = _round_up(B, 8)
    if B8 <= max_tb:
        return B8, B8                       # single batch tile, minimal padding
    for tb in _TB_CANDIDATES:
        if tb > max_tb:
            continue
        Bp = _round_up(B, tb)
        if Bp - B8 <= 0.125 * B8:
            return Bp, tb
    return B8, 8


# ----------------------------------------------------------------------------
# Single-step cell kernel
# ----------------------------------------------------------------------------

def _lstm_cell_kernel(x_ref, h_ref, c_ref, wx_ref, wh_ref, b_ref,
                      ht_ref, ct_ref, *, tn):
    # Two accumulating MXU dots (x-side + h-side), f32 accumulation.
    gates = jnp.dot(x_ref[...], wx_ref[...], preferred_element_type=jnp.float32)
    gates = gates + jnp.dot(h_ref[...], wh_ref[...],
                            preferred_element_type=jnp.float32)
    gates = gates + b_ref[...]                       # f32 bias

    # Gate order inside this lane tile: [i | f | g(c) | o], each width tn.
    i_g = jax.nn.sigmoid(gates[:, 0 * tn:1 * tn])
    f_g = jax.nn.sigmoid(gates[:, 1 * tn:2 * tn])
    g_g = jnp.tanh(gates[:, 2 * tn:3 * tn])
    o_g = jax.nn.sigmoid(gates[:, 3 * tn:4 * tn])

    ct = f_g * c_ref[...] + i_g * g_g                # f32 cell-state carry
    ht = o_g * jnp.tanh(ct)

    ct_ref[...] = ct
    ht_ref[...] = ht.astype(ht_ref.dtype)


def prepare_lstm_weights(wx, wh, b, *, max_tn=512, compute_dtype=jnp.bfloat16):
    """Pack LSTM weights ONCE (reusable across timesteps / calls).

    wx: (I, 4H)  x-side weights (already transposed), gate order [i, f, c, o]
    wh: (H, 4H)  h-side weights (bias=False in the module)
    b : (1, 4H)  x-side biases
    Returns (wx_p, wh_p, b_p, (Ip, Hp, nH, tn)); weight columns are reordered
    hidden-tile-major / gate-minor so each (rows, 4*tn) block is gate-complete
    and (8,128)-aligned (lane-dense, unmasked stores).
    """
    I, four_h = wx.shape
    H = four_h // 4
    assert wh.shape == (H, 4 * H) and b.shape == (1, 4 * H)
    Hp, tn = _pick_tn(H, max_tn)
    nH = Hp // tn
    Ip = _round_up(I, 128)

    def pack_w(w, rows, rows_p):
        w = w.reshape(rows, 4, H)
        w = jnp.pad(w, ((0, rows_p - rows), (0, 0), (0, Hp - H)))
        w = w.reshape(rows_p, 4, nH, tn).transpose(0, 2, 1, 3)
        return w.reshape(rows_p, nH * 4 * tn).astype(compute_dtype)

    wx_p = pack_w(wx, I, Ip)
    wh_p = pack_w(wh, H, Hp)

    bb = jnp.pad(b.reshape(1, 4, H), ((0, 0), (0, 0), (0, Hp - H)))
    bb = bb.reshape(1, 4, nH, tn).transpose(0, 2, 1, 3)
    b_p = bb.reshape(1, nH * 4 * tn).astype(jnp.float32)
    return wx_p, wh_p, b_p, (Ip, Hp, nH, tn)


def lstm_cell_step_packed(x_p, h_p, c_p, packed, *, tb=512, ht_dtype=None,
                          alias_ct=True, vmem_budget=_VMEM_BUDGET):
    """One LSTM step on padded state.

    x_p: (Bp, Ip) compute-dtype, h_p: (Bp, Hp) compute-dtype, c_p: (Bp, Hp) f32.
    Returns (ht_p (Bp, Hp) ht_dtype, ct_p (Bp, Hp) f32). ct is updated
    in-place via input_output_aliases (carry c_p padded across steps).
    """
    wx_p, wh_p, b_p, (Ip, Hp, nH, tn) = packed
    Bp = x_p.shape[0]
    assert x_p.shape == (Bp, Ip) and h_p.shape == (Bp, Hp)
    assert c_p.shape == (Bp, Hp) and c_p.dtype == jnp.float32
    if ht_dtype is None:
        ht_dtype = h_p.dtype
    cbytes = jnp.dtype(wx_p.dtype).itemsize
    hbytes = jnp.dtype(ht_dtype).itemsize

    # Double-buffered VMEM footprint: weights (TB-independent) + per-row part.
    weight_bytes = 2 * (Ip + Hp) * 4 * tn * cbytes + 2 * 8 * 4 * tn * 4
    per_row = 2 * ((Ip + Hp) * cbytes + tn * 4 + tn * hbytes + tn * 4)
    max_tb_vmem = max(8, ((vmem_budget - weight_bytes) // max(per_row, 1))
                      // 8 * 8)
    TB = max(8, (min(tb, max_tb_vmem, Bp) // 8) * 8)
    while Bp % TB != 0:          # Bp, TB are multiples of 8 -> terminates at 8
        TB -= 8
    nB = Bp // TB
    est = weight_bytes + TB * per_row
    vmem_limit = int(min(max(est + 16 * 2 ** 20, 32 * 2 ** 20), 56 * 2 ** 20))

    kernel = functools.partial(_lstm_cell_kernel, tn=tn)

    # Grid: hidden tiles OUTER (sharded across TCs), batch tiles INNER so the
    # weight tiles are not re-fetched across the inner sweep.
    ht_p, ct_p = pl.pallas_call(
        kernel,
        out_shape=(
            jax.ShapeDtypeStruct((Bp, Hp), ht_dtype),       # ht
            jax.ShapeDtypeStruct((Bp, Hp), jnp.float32),    # ct (f32 carry)
        ),
        grid=(nH, nB),
        in_specs=[
            pl.BlockSpec((TB, Ip), lambda j, i: (i, 0)),        # xt tile
            pl.BlockSpec((TB, Hp), lambda j, i: (i, 0)),        # ht_1 tile
            pl.BlockSpec((TB, tn), lambda j, i: (i, j)),        # ct_1 tile
            pl.BlockSpec((Ip, 4 * tn), lambda j, i: (0, j)),    # Wx gate block
            pl.BlockSpec((Hp, 4 * tn), lambda j, i: (0, j)),    # Wh gate block
            pl.BlockSpec((1, 4 * tn), lambda j, i: (0, j)),     # bias block
        ],
        out_specs=(
            pl.BlockSpec((TB, tn), lambda j, i: (i, j)),
            pl.BlockSpec((TB, tn), lambda j, i: (i, j)),
        ),
        input_output_aliases=({2: 1} if alias_ct else {}),
        compiler_params=pltpu.CompilerParams(
            dimension_semantics=("parallel", "arbitrary"),
            vmem_limit_bytes=vmem_limit),
    )(x_p, h_p, c_p, wx_p, wh_p, b_p)
    return ht_p, ct_p


def lstm_cell_pallas(xt, ht_1, ct_1, wx, wh, b, *, packed=None, tb=512,
                     max_tn=512, compute_dtype=jnp.bfloat16, ht_dtype=None):
    """Module-parity convenience wrapper: one LSTM-cell step, returns (ht, ct).

    Pass `packed=prepare_lstm_weights(...)` to avoid re-packing per call.
    """
    B, I = xt.shape
    _, H = ht_1.shape
    assert ct_1.shape == (B, H)
    if packed is None:
        packed = prepare_lstm_weights(wx, wh, b, max_tn=max_tn,
                                      compute_dtype=compute_dtype)
    wx_p, _, _, (Ip, Hp, nH, tn) = packed
    cdtype = wx_p.dtype
    if ht_dtype is None:
        ht_dtype = xt.dtype

    Bp, TB = _pick_batch_tiling(B, tb)
    x_p = jnp.pad(xt.astype(cdtype), ((0, Bp - B), (0, Ip - I)))
    h_p = jnp.pad(ht_1.astype(cdtype), ((0, Bp - B), (0, Hp - H)))
    c_p = jnp.pad(ct_1.astype(jnp.float32), ((0, Bp - B), (0, Hp - H)))

    ht_p, ct_p = lstm_cell_step_packed(x_p, h_p, c_p, packed, tb=TB,
                                       ht_dtype=ht_dtype)
    return ht_p[:B, :H], ct_p[:B, :H].astype(ct_1.dtype)


# ----------------------------------------------------------------------------
# Full-sequence kernel: X@Wx hoisted out, Wh VMEM-resident across grid=(T,)
# ----------------------------------------------------------------------------

def _lstm_seq_kernel(xg_ref, h0_ref, c0_ref, wh_ref, hseq_ref, ct_ref,
                     h_sc, *, Hp):
    t = pl.program_id(0)

    @pl.when(t == 0)
    def _():
        h_sc[...] = h0_ref[...]
        ct_ref[...] = c0_ref[...]

    # Only the (small) h-side matmul lives in the recurrence; Wh block index
    # is constant across T, so it is DMA'd into VMEM exactly once.
    gates = xg_ref[0] + jnp.dot(h_sc[...].astype(wh_ref.dtype), wh_ref[...],
                                preferred_element_type=jnp.float32)
    i_g = jax.nn.sigmoid(gates[:, 0 * Hp:1 * Hp])
    f_g = jax.nn.sigmoid(gates[:, 1 * Hp:2 * Hp])
    g_g = jnp.tanh(gates[:, 2 * Hp:3 * Hp])
    o_g = jax.nn.sigmoid(gates[:, 3 * Hp:4 * Hp])

    ct = f_g * ct_ref[...] + i_g * g_g
    ht = o_g * jnp.tanh(ct)

    ct_ref[...] = ct
    h_sc[...] = ht
    hseq_ref[0] = ht.astype(hseq_ref.dtype)


def lstm_sequence_pallas(xs, h0, c0, wx, wh, b, *, compute_dtype=jnp.float32,
                         ht_dtype=None):
    """Runs T LSTM steps. Returns (hseq (T,B,H), ht_T, ct_T)."""
    T, B, I = xs.shape
    H = h0.shape[-1]
    assert h0.shape == (B, H) and c0.shape == (B, H)
    if ht_dtype is None:
        ht_dtype = xs.dtype
    Hp = _round_up(H, 128)
    Bp = _round_up(B, 8)

    # (1) Hoist the x-side matmul (+bias) out of the recurrence: ONE big MXU
    #     matmul over all T timesteps, done by XLA outside the kernel.
    xg = jnp.einsum('tbi,ig->tbg', xs, wx) + b            # (T, B, 4H) f32
    xg = xg.reshape(T, B, 4, H)
    xg = jnp.pad(xg, ((0, 0), (0, Bp - B), (0, 0), (0, Hp - H)))
    xg = xg.reshape(T, Bp, 4 * Hp).astype(jnp.float32)

    wh_p = jnp.pad(wh.reshape(H, 4, H), ((0, Hp - H), (0, 0), (0, Hp - H)))
    wh_p = wh_p.reshape(Hp, 4 * Hp).astype(compute_dtype)
    h0_p = jnp.pad(h0.astype(jnp.float32), ((0, Bp - B), (0, Hp - H)))
    c0_p = jnp.pad(c0.astype(jnp.float32), ((0, Bp - B), (0, Hp - H)))

    cb = jnp.dtype(compute_dtype).itemsize
    hb = jnp.dtype(ht_dtype).itemsize
    est = (2 * Bp * 4 * Hp * 4 + 2 * 2 * Bp * Hp * 4 + 2 * Hp * 4 * Hp * cb
           + 2 * Bp * Hp * hb + 2 * Bp * Hp * 4 + Bp * Hp * 4)
    vmem_limit = int(min(max(est + 16 * 2 ** 20, 32 * 2 ** 20), 56 * 2 ** 20))

    kernel = functools.partial(_lstm_seq_kernel, Hp=Hp)
    hseq_p, ct_p = pl.pallas_call(
        kernel,
        out_shape=(
            jax.ShapeDtypeStruct((T, Bp, Hp), ht_dtype),     # per-step ht
            jax.ShapeDtypeStruct((Bp, Hp), jnp.float32),     # final ct
        ),
        grid=(T,),
        in_specs=[
            pl.BlockSpec((1, Bp, 4 * Hp), lambda t: (t, 0, 0)),  # precomputed xW+b
            pl.BlockSpec((Bp, Hp), lambda t: (0, 0)),            # h0
            pl.BlockSpec((Bp, Hp), lambda t: (0, 0)),            # c0
            pl.BlockSpec((Hp, 4 * Hp), lambda t: (0, 0)),        # Wh (resident)
        ],
        out_specs=(
            pl.BlockSpec((1, Bp, Hp), lambda t: (t, 0, 0)),
            pl.BlockSpec((Bp, Hp), lambda t: (0, 0)),
        ),
        scratch_shapes=[pltpu.VMEM((Bp, Hp), jnp.float32)],       # carried ht
        compiler_params=pltpu.CompilerParams(
            dimension_semantics=("arbitrary",),
            vmem_limit_bytes=vmem_limit),
    )(xg, h0_p, c0_p, wh_p)

    hseq = hseq_p[:, :B, :H]
    return hseq, hseq[-1], ct_p[:B, :H].astype(c0.dtype)


# ----------------------------------------------------------------------------
# Pure-JAX reference + test harness
# ----------------------------------------------------------------------------

def _reference_lstm_cell(xt, ht_1, ct_1, wx, wh, b):
    """Pure-JAX f32 reference mirroring the PyTorch forward."""
    H = ht_1.shape[-1]
    gates = xt @ wx + ht_1 @ wh + b
    i_g = jax.nn.sigmoid(gates[:, 0 * H:1 * H])
    f_g = jax.nn.sigmoid(gates[:, 1 * H:2 * H])
    g_g = jnp.tanh(gates[:, 2 * H:3 * H])
    o_g = jax.nn.sigmoid(gates[:, 3 * H:4 * H])
    ct = f_g * ct_1 + i_g * g_g
    ht = o_g * jnp.tanh(ct)
    return ht, ct


def _make_inputs(key, B, I, H):
    ks = jax.random.split(key, 12)
    xt = jax.random.normal(ks[0], (B, I), dtype=jnp.float32)
    ht_1 = jax.random.normal(ks[1], (B, H), dtype=jnp.float32)
    ct_1 = jax.random.normal(ks[2], (B, H), dtype=jnp.float32)

    def init_w(k, fan_in, shape):
        bound = 1.0 / jnp.sqrt(jnp.float32(fan_in))
        return jax.random.uniform(k, shape, jnp.float32, -bound, bound)

    # Per-gate parameters [i, f, c, o]; x-side has bias, h-side has none.
    wxi = init_w(ks[3], I, (I, H)); wxf = init_w(ks[4], I, (I, H))
    wxc = init_w(ks[5], I, (I, H)); wxo = init_w(ks[6], I, (I, H))
    bxi = init_w(ks[7], I, (H,));   bxf = init_w(ks[8], I, (H,))
    bxc = init_w(ks[9], I, (H,));   bxo = init_w(ks[10], I, (H,))
    kh = jax.random.split(ks[11], 4)
    whi = init_w(kh[0], H, (H, H)); whf = init_w(kh[1], H, (H, H))
    whc = init_w(kh[2], H, (H, H)); who = init_w(kh[3], H, (H, H))

    wx = jnp.concatenate([wxi, wxf, wxc, wxo], axis=1)            # (I, 4H)
    wh = jnp.concatenate([whi, whf, whc, who], axis=1)            # (H, 4H)
    b = jnp.concatenate([bxi, bxf, bxc, bxo], axis=0)[None, :]    # (1, 4H)
    return xt, ht_1, ct_1, wx, wh, b


if __name__ == "__main__":
    key = jax.random.PRNGKey(0)
    k1, k2, k3 = jax.random.split(key, 3)

    # --- Case 1: shapes implied by the module (small B, I, H) ----------------
    B, INPUT_NUM, HIDDEN_NUM = 8, 16, 32
    xt, ht_1, ct_1, wx, wh, b = _make_inputs(k1, B, INPUT_NUM, HIDDEN_NUM)
    ht_ref, ct_ref = _reference_lstm_cell(xt, ht_1, ct_1, wx, wh, b)

    # Pack the weights ONCE per dtype, reuse across calls.
    packed_bf16 = prepare_lstm_weights(wx, wh, b, compute_dtype=jnp.bfloat16)
    packed_f32 = prepare_lstm_weights(wx, wh, b, compute_dtype=jnp.float32)

    # bf16 MXU path: loose tolerance vs the f32 reference.
    ht, ct = lstm_cell_pallas(xt, ht_1, ct_1, wx, wh, b, packed=packed_bf16)
    jax.block_until_ready((ht, ct))
    assert ht.shape == (B, HIDDEN_NUM) and ct.shape == (B, HIDDEN_NUM)
    assert jnp.allclose(ht, ht_ref, atol=2e-2, rtol=2e-2)
    assert jnp.allclose(ct, ct_ref, atol=2e-2, rtol=2e-2)

    # f32 path: tight tolerance (checks tiling/layout math exactly).
    ht32, ct32 = lstm_cell_pallas(xt, ht_1, ct_1, wx, wh, b, packed=packed_f32)
    jax.block_until_ready((ht32, ct32))
    assert jnp.allclose(ht32, ht_ref, atol=1e-5, rtol=1e-5)
    assert jnp.allclose(ct32, ct_ref, atol=1e-5, rtol=1e-5)

    # --- Case 2: multi hidden tiles + multi batch tiles (batch-inner grid) ---
    B2, I2, H2 = 256, 24, 384     # Hp=384 -> 3 hidden tiles; tb=128 -> 2 batch tiles
    xt2, ht2_1, ct2_1, wx2, wh2, b2 = _make_inputs(k2, B2, I2, H2)
    ht2_ref, ct2_ref = _reference_lstm_cell(xt2, ht2_1, ct2_1, wx2, wh2, b2)
    packed2 = prepare_lstm_weights(wx2, wh2, b2, compute_dtype=jnp.float32)
    ht2, ct2 = lstm_cell_pallas(xt2, ht2_1, ct2_1, wx2, wh2, b2,
                                packed=packed2, tb=128)
    jax.block_until_ready((ht2, ct2))
    assert ht2.shape == (B2, H2) and ct2.shape == (B2, H2)
    assert jnp.allclose(ht2, ht2_ref, atol=1e-5, rtol=1e-5)
    assert jnp.allclose(ct2, ct2_ref, atol=1e-5, rtol=1e-5)

    # --- Case 3: full sequence with hoisted X@Wx and VMEM-resident Wh --------
    T = 8
    xs = jax.random.normal(k3, (T, B, INPUT_NUM), dtype=jnp.float32)
    hseq, ht_T, ct_T = lstm_sequence_pallas(xs, ht_1, ct_1, wx, wh, b,
                                            compute_dtype=jnp.float32)
    jax.block_until_ready((hseq, ht_T, ct_T))

    def _ref_step(carry, x):
        h, c = carry
        h2, c2 = _reference_lstm_cell(x, h, c, wx, wh, b)
        return (h2, c2), h2

    (hT_ref, cT_ref), hseq_ref = jax.lax.scan(_ref_step, (ht_1, ct_1), xs)
    assert hseq.shape == (T, B, HIDDEN_NUM)
    assert jnp.allclose(hseq, hseq_ref, atol=2e-4, rtol=2e-4)
    assert jnp.allclose(ht_T, hT_ref, atol=2e-4, rtol=2e-4)
    assert jnp.allclose(ct_T, cT_ref, atol=2e-4, rtol=2e-4)

    print("KERNEL_OK")
</pallas_src>

<mosaic_0001>
module attributes {stable_mosaic.version = 11 : i64} {
  func.func @_lstm_cell_kernel(%arg0: i32, %arg1: i32, %arg2: memref<8x128xbf16, #tpu.memory_space<vmem>>, %arg3: memref<8x128xbf16, #tpu.memory_space<vmem>>, %arg4: memref<8x128xf32, #tpu.memory_space<vmem>>, %arg5: memref<128x512xbf16, #tpu.memory_space<vmem>>, %arg6: memref<128x512xbf16, #tpu.memory_space<vmem>>, %arg7: memref<1x512xf32, #tpu.memory_space<vmem>>, %arg8: memref<8x128xf32, #tpu.memory_space<vmem>>, %arg9: memref<8x128xf32, #tpu.memory_space<vmem>>) attributes {dimension_semantics = [#tpu.dimension_semantics<parallel>, #tpu.dimension_semantics<arbitrary>], iteration_bounds = array<i64: 1, 1>, scalar_prefetch = 0 : i64, scratch_operands = 0 : i64, tpu.core_type = #tpu.core_type<tc>, window_params = [{transform_indices = @transform_0, window_bounds = array<i64: 8, 128>}, {transform_indices = @transform_1, window_bounds = array<i64: 8, 128>}, {transform_indices = @transform_2, window_bounds = array<i64: 8, 128>}, {transform_indices = @transform_3, window_bounds = array<i64: 128, 512>}, {transform_indices = @transform_4, window_bounds = array<i64: 128, 512>}, {transform_indices = @transform_5, window_bounds = array<i64: 1, 512>}, {transform_indices = @transform_6, window_bounds = array<i64: 8, 128>}, {transform_indices = @transform_7, window_bounds = array<i64: 8, 128>}]} {
    %c0 = arith.constant 0 : index
    %c0_0 = arith.constant 0 : index
    %0 = vector.load %arg2[%c0, %c0_0] : memref<8x128xbf16, #tpu.memory_space<vmem>>, vector<8x128xbf16>
    %c0_1 = arith.constant 0 : index
    %c0_2 = arith.constant 0 : index
    %1 = vector.load %arg5[%c0_1, %c0_2] : memref<128x512xbf16, #tpu.memory_space<vmem>>, vector<128x512xbf16>
    %cst = arith.constant dense<0.000000e+00> : vector<8x512xf32>
    %2 = tpu.matmul %0, %1, %cst {dimension_numbers = #tpu.dot_dimension_numbers<[1], [0], [0], [1], [0, 0, 1, 1], [], []>} : vector<8x128xbf16>, vector<128x512xbf16>, vector<8x512xf32> -> vector<8x512xf32>
    %c0_3 = arith.constant 0 : index
    %c0_4 = arith.constant 0 : index
    %3 = vector.load %arg3[%c0_3, %c0_4] : memref<8x128xbf16, #tpu.memory_space<vmem>>, vector<8x128xbf16>
    %c0_5 = arith.constant 0 : index
    %c0_6 = arith.constant 0 : index
    %4 = vector.load %arg6[%c0_5, %c0_6] : memref<128x512xbf16, #tpu.memory_space<vmem>>, vector<128x512xbf16>
    %cst_7 = arith.constant dense<0.000000e+00> : vector<8x512xf32>
    %5 = tpu.matmul %3, %4, %cst_7 {dimension_numbers = #tpu.dot_dimension_numbers<[1], [0], [0], [1], [0, 0, 1, 1], [], []>} : vector<8x128xbf16>, vector<128x512xbf16>, vector<8x512xf32> -> vector<8x512xf32>
    %6 = arith.addf %2, %5 : vector<8x512xf32>
    %c0_8 = arith.constant 0 : index
    %c0_9 = arith.constant 0 : index
    %7 = vector.load %arg7[%c0_8, %c0_9] : memref<1x512xf32, #tpu.memory_space<vmem>>, vector<1x512xf32>
    %8 = vector.broadcast %7 : vector<1x512xf32> to vector<8x512xf32>
    %9 = arith.addf %6, %8 : vector<8x512xf32>
    %10 = vector.extract_strided_slice %9 {offsets = [0, 0], sizes = [8, 128], strides = [1, 1]} : vector<8x512xf32> to vector<8x128xf32>
    %11 = arith.negf %10 : vector<8x128xf32>
    %12 = math.exp %11 : vector<8x128xf32>
    %cst_10 = arith.constant 1.000000e+00 : f32
    %13 = vector.broadcast %cst_10 : f32 to vector<8x128xf32>
    %14 = arith.addf %13, %12 : vector<8x128xf32>
    %15 = arith.divf %13, %14 : vector<8x128xf32>
    %16 = vector.extract_strided_slice %9 {offsets = [0, 128], sizes = [8, 128], strides = [1, 1]} : vector<8x512xf32> to vector<8x128xf32>
    %17 = arith.negf %16 : vector<8x128xf32>
    %18 = math.exp %17 : vector<8x128xf32>
    %cst_11 = arith.constant 1.000000e+00 : f32
    %19 = vector.broadcast %cst_11 : f32 to vector<8x128xf32>
    %20 = arith.addf %19, %18 : vector<8x128xf32>
    %21 = arith.divf %19, %20 : vector<8x128xf32>
    %22 = vector.extract_strided_slice %9 {offsets = [0, 256], sizes = [8, 128], strides = [1, 1]} : vector<8x512xf32> to vector<8x128xf32>
    %23 = math.tanh %22 : vector<8x128xf32>
    %24 = vector.extract_strided_slice %9 {offsets = [0, 384], sizes = [8, 128], strides = [1, 1]} : vector<8x512xf32> to vector<8x128xf32>
    %25 = arith.negf %24 : vector<8x128xf32>
    %26 = math.exp %25 : vector<8x128xf32>
    %cst_12 = arith.constant 1.000000e+00 : f32
    %27 = vector.broadcast %cst_12 : f32 to vector<8x128xf32>
    %28 = arith.addf %27, %26 : vector<8x128xf32>
    %29 = arith.divf %27, %28 : vector<8x128xf32>
    %c0_13 = arith.constant 0 : index
    %c0_14 = arith.constant 0 : index
    %30 = vector.load %arg4[%c0_13, %c0_14] : memref<8x128xf32, #tpu.memory_space<vmem>>, vector<8x128xf32>
    %31 = arith.mulf %21, %30 : vector<8x128xf32>
    %32 = arith.mulf %15, %23 : vector<8x128xf32>
    %33 = arith.addf %31, %32 : vector<8x128xf32>
    %34 = math.tanh %33 : vector<8x128xf32>
    %35 = arith.mulf %29, %34 : vector<8x128xf32>
    %c0_15 = arith.constant 0 : index
    %c0_16 = arith.constant 0 : index
    %36 = vector.load %arg9[%c0_15, %c0_16] : memref<8x128xf32, #tpu.memory_space<vmem>>, vector<8x128xf32>
    tpu.vector_store %arg9[%c0_15, %c0_16], %33 {strides = array<i32>} : memref<8x128xf32, #tpu.memory_space<vmem>>, vector<8x128xf32>,
    %c0_17 = arith.constant 0 : index
    %c0_18 = arith.constant 0 : index
    %37 = vector.load %arg8[%c0_17, %c0_18] : memref<8x128xf32, #tpu.memory_space<vmem>>, vector<8x128xf32>
    tpu.vector_store %arg8[%c0_17, %c0_18], %35 {strides = array<i32>} : memref<8x128xf32, #tpu.memory_space<vmem>>, vector<8x128xf32>,
    return
  }
  func.func @transform_0(%arg0: i32, %arg1: i32) -> (i32, i32) {
    %c0_i32 = arith.constant 0 : i32
    %c0_i32_0 = arith.constant 0 : i32
    return %arg1, %c0_i32 : i32, i32
  }
  func.func @transform_1(%arg0: i32, %arg1: i32) -> (i32, i32) {
    %c0_i32 = arith.constant 0 : i32
    %c0_i32_0 = arith.constant 0 : i32
    return %arg1, %c0_i32 : i32, i32
  }
  func.func @transform_2(%arg0: i32, %arg1: i32) -> (i32, i32) {
    %c0_i32 = arith.constant 0 : i32
    return %arg1, %arg0 : i32, i32
  }
  func.func @transform_3(%arg0: i32, %arg1: i32) -> (i32, i32) {
    %c0_i32 = arith.constant 0 : i32
    %c0_i32_0 = arith.constant 0 : i32
    return %c0_i32, %arg0 : i32, i32
  }
  func.func @transform_4(%arg0: i32, %arg1: i32) -> (i32, i32) {
    %c0_i32 = arith.constant 0 : i32
    %c0_i32_0 = arith.constant 0 : i32
    return %c0_i32, %arg0 : i32, i32
  }
  func.func @transform_5(%arg0: i32, %arg1: i32) -> (i32, i32) {
    %c0_i32 = arith.constant 0 : i32
    %c0_i32_0 = arith.constant 0 : i32
    return %c0_i32, %arg0 : i32, i32
  }
  func.func @transform_6(%arg0: i32, %arg1: i32) -> (i32, i32) {
    %c0_i32 = arith.constant 0 : i32
    return %arg1, %arg0 : i32, i32
  }
  func.func @transform_7(%arg0: i32, %arg1: i32) -> (i32, i32) {
    %c0_i32 = arith.constant 0 : i32
    return %arg1, %arg0 : i32, i32
  }
}

</mosaic_0001>

<bundles_post_ra>
// kernel: tpu_custom_call.1
= control target key start
LH: loop header
LB: loop body
LE: loop exit
PB: predicated region body
PF: predicated region fallthrough
CT: control target
= control target key end

     0   :  { %13 = vsyncpa [#allocation3], 0  ;;  %s1132_s0 = inlined_call_operand.vmem [shape: bf16[8,128], index: 0, kind: input, shape index: {}]   ;;  %s1133_s1 = inlined_call_operand.vmem [shape: bf16[8,128], index: 1, kind: input, shape index: {}]   ;;  %s1134_s2 = inlined_call_operand.hbm [shape: f32[8,128], index: 2, kind: input, shape index: {}, may-alias: {2,7}]   ;;  %s1135_s3 = inlined_call_operand.hbm [shape: bf16[128,512], index: 3, kind: input, shape index: {}]   ;;  %s1136_s4 = inlined_call_operand.hbm [shape: bf16[128,512], index: 4, kind: input, shape index: {}]   ;;  %s1137_s5 = inlined_call_operand.vmem [shape: f32[1,512], index: 5, kind: input, shape index: {}]   ;;  %s1138_s6 = inlined_call_operand.hbm [shape: f32[8,128], index: 6, kind: output, shape index: {0}]   ;;  %s1139_s7 = inlined_call_operand.hbm [shape: f32[8,128], index: 7, kind: output, shape index: {1}, may-alias: {2,7}]  }
   0x1   :  { %14 = vsyncpa [#allocation6], 0 }
   0x2   :  { %15 = vsyncpa [#allocation4], 0 }
   0x3   :  { %16 = vsyncpa [#allocation10], 0  ;;  %s1005_s24 = smov [#allocation5]   ;;  %s887_s28 = scalar_lea.hbm %s1135_s3, 4096 }
   0x4   :  { %s36_s25 = sshll.u32 %s1005_s24, 4  ;;  %p888_p0 = scmp.ne.s32.totalorder %s1135_s3, %s887_s28  ;;  %s37_s25 = int_to_ptr.vmem [resolvable:$true] %s36_s25 }
   0x5   :  { %p891_p1 = scmp.lt.u32.totalorder %s887_s28, %s1135_s3 }
   0x7   :  { %p893_p2 = pnand %p891_p1, %p888_p0 }
   0x9   :  { %896 = shalt.err (!%p893_p2)
}
   0xa   :  { %s897_s10 = scalar_lea.vmem %s37_s25, 4096  ;;  %p902_p4 = scmp.lt.s32.totalorder %s37_s25, %s37_s25 }
   0xb   :  { %p898_p3 = scmp.ne.s32.totalorder %s37_s25, %s897_s10  ;;  %p903_p5 = scmp.lt.s32.totalorder %s897_s10, %s897_s10 }
   0xd   :  { %p904_p6 = por %p903_p5, %p902_p4 }
   0xf   :  { %p905_p7 = pnand %p904_p6, %p898_p3 }
  0x11   :  { %908 = shalt.err (!%p905_p7)
}
  0x12   :  { %s1006_s11 = smov 256   ;;  %s1007_s12 = smov 16  }
  0x13   :  { %42 = dma.hbm_to_vmem [thread:$0]  %s1135_s3, 4096, %s37_s25, [#allocation6], %s1006_s11, %s1006_s11, %s1007_s12  }
  0x14   :  { %s1008_s15 = smov [#allocation2]   ;;  %s1009_s17 = smov [#allocation7]  }
  0x15   :  { %s27_s16 = sshll.u32 %s1008_s15, 4  ;;  %s48_s18 = sshll.u32 %s1009_s17, 4  ;;  %s28_s16 = int_to_ptr.vmem [resolvable:$true] %s27_s16  ;;  %s49_s18 = int_to_ptr.vmem [resolvable:$true] %s48_s18 }
  0x16   :  { %s909_s21 = scalar_lea.hbm %s1134_s2, 128 }
  0x17   :  { %p910_p8 = scmp.ne.s32.totalorder %s1134_s2, %s909_s21  ;;  %p913_p9 = scmp.lt.u32.totalorder %s909_s21, %s1134_s2 }
  0x19   :  { %p915_p10 = pnand %p913_p9, %p910_p8 }
  0x1b   :  { %918 = shalt.err (!%p915_p10)
}
  0x1c   :  { %s919_s3 = scalar_lea.vmem %s28_s16, 128  ;;  %p924_p12 = scmp.lt.s32.totalorder %s28_s16, %s28_s16 }
  0x1d   :  { %p920_p11 = scmp.ne.s32.totalorder %s28_s16, %s919_s3  ;;  %p925_p13 = scmp.lt.s32.totalorder %s919_s3, %s919_s3 }
  0x1f   :  { %p926_p0 = por %p925_p13, %p924_p12 }
  0x21   :  { %p927_p1 = pnand %p926_p0, %p920_p11 }
  0x23   :  { %930 = shalt.err (!%p927_p1)
}
  0x24   :  { %30 = dma.hbm_to_vmem [thread:$0]  %s1134_s2, 128, %s28_s16, [#allocation3]  }
  0x25   :  { %s931_s30 = scalar_lea.hbm %s1136_s4, 4096 }
  0x26   :  { %p932_p2 = scmp.ne.s32.totalorder %s1136_s4, %s931_s30  ;;  %p935_p3 = scmp.lt.u32.totalorder %s931_s30, %s1136_s4 }
  0x28   :  { %p937_p4 = pnand %p935_p3, %p932_p2 }
  0x2a   :  { %940 = shalt.err (!%p937_p4)
}
  0x2b   :  { %s941_s14 = scalar_lea.vmem %s49_s18, 4096  ;;  %p946_p6 = scmp.lt.s32.totalorder %s49_s18, %s49_s18 }
  0x2c   :  { %p942_p5 = scmp.ne.s32.totalorder %s49_s18, %s941_s14  ;;  %p947_p7 = scmp.lt.s32.totalorder %s941_s14, %s941_s14 }
  0x2e   :  { %p948_p8 = por %p947_p7, %p946_p6 }
  0x30   :  { %p949_p9 = pnand %p948_p8, %p942_p5 }
  0x32   :  { %952 = shalt.err (!%p949_p9)
}
  0x33   :  { %54 = dma.hbm_to_vmem [thread:$0]  %s1136_s4, 4096, %s49_s18, [#allocation6], %s1006_s11, %s1006_s11, %s1007_s12  }
  0x34   :  { %997 = dma.done.wait [#allocation3], 128  }
  0x35   :  { %998 = vsyncadd [#allocation3], 4294967168 }
  0x36   :  { %999 = dma.done.wait [#allocation6], 8192  }
  0x37   :  { %1000 = vsyncadd [#allocation6], 4294959104  ;;  %v1010_v0 = vmov 0   ;;  %v775_v1 = vld [vmem:[#allocation7 + $0x4] ss:$16 sps:$4 sm:$0xff]  }
  0x38   :  { %325 = vmatprep.mubr.bf16.mxu0 %v1010_v0  ;;  %366 = vmatprep.mubr.bf16.mxu1 %v1010_v0  ;;  %v777_v2 = vld [vmem:[#allocation7 + $0xc] ss:$16 sps:$4 sm:$0xff]   ;;  %v779_v3 = vld [vmem:[#allocation7] ss:$16 sps:$4 sm:$0xff]   ;;  %v780_v4 = vld [vmem:[#allocation7 + $0x8] ss:$16 sps:$4 sm:$0xff]  }
  0x39   :  { %293 = vmatprep.subr.bf16.mxu0 %v775_v1  ;;  %334 = vmatprep.subr.bf16.mxu1 %v777_v2  ;;  %v781_v5 = vld [vmem:[#allocation7 + $0x24] ss:$16 sps:$4 sm:$0xff]   ;;  %v783_v6 = vld [vmem:[#allocation7 + $0x2c] ss:$16 sps:$4 sm:$0xff]   ;;  %v785_v7 = vld [vmem:[#allocation7 + $0x20] ss:$16 sps:$4 sm:$0xff]  }
  0x3a   :  { %294 = vmatpush1.bf16.msra.mxu0 %v779_v3  ;;  %335 = vmatpush1.bf16.msra.mxu1 %v780_v4  ;;  %v786_v8 = vld [vmem:[#allocation7 + $0x28] ss:$16 sps:$4 sm:$0xff]   ;;  %v787_v9 = vld [vmem:[#allocation7 + $0x44] ss:$16 sps:$4 sm:$0xff]   ;;  %v789_v10 = vld [vmem:[#allocation7 + $0x4c] ss:$16 sps:$4 sm:$0xff]  }
  0x3b   :  { %295 = vmatprep.subr.bf16.mxu0 %v781_v5  ;;  %336 = vmatprep.subr.bf16.mxu1 %v783_v6  ;;  %v791_v11 = vld [vmem:[#allocation7 + $0x40] ss:$16 sps:$4 sm:$0xff]   ;;  %v792_v12 = vld [vmem:[#allocation7 + $0x48] ss:$16 sps:$4 sm:$0xff]   ;;  %v793_v13 = vld [vmem:[#allocation7 + $0x64] ss:$16 sps:$4 sm:$0xff]  }
  0x3c   :  { %v795_v14 = vld [vmem:[#allocation7 + $0x6c] ss:$16 sps:$4 sm:$0xff]   ;;  %v797_v15 = vld [vmem:[#allocation7 + $0x60] ss:$16 sps:$4 sm:$0xff]   ;;  %v798_v16 = vld [vmem:[#allocation7 + $0x68] ss:$16 sps:$4 sm:$0xff]  }
  0x3d   :  { %v799_v17 = vld [vmem:[#allocation7 + $0x84] ss:$16 sps:$4 sm:$0xff]   ;;  %v801_v18 = vld [vmem:[#allocation7 + $0x8c] ss:$16 sps:$4 sm:$0xff]   ;;  %v803_v19 = vld [vmem:[#allocation7 + $0x80] ss:$16 sps:$4 sm:$0xff]  }
  0x3e   :  { %296 = vmatpush1.bf16.msra.mxu0 %v785_v7  ;;  %337 = vmatpush1.bf16.msra.mxu1 %v786_v8  ;;  %v804_v20 = vld [vmem:[#allocation7 + $0x88] ss:$16 sps:$4 sm:$0xff]   ;;  %v805_v21 = vld [vmem:[#allocation7 + $0xa4] ss:$16 sps:$4 sm:$0xff]   ;;  %v807_v22 = vld [vmem:[#allocation7 + $0xac] ss:$16 sps:$4 sm:$0xff]  }
  0x3f   :  { %297 = vmatprep.subr.bf16.mxu0 %v787_v9  ;;  %338 = vmatprep.subr.bf16.mxu1 %v789_v10  ;;  %v809_v23 = vld [vmem:[#allocation7 + $0xa0] ss:$16 sps:$4 sm:$0xff]   ;;  %v810_v24 = vld [vmem:[#allocation7 + $0xa8] ss:$16 sps:$4 sm:$0xff]   ;;  %v811_v25 = vld [vmem:[#allocation7 + $0xc4] ss:$16 sps:$4 sm:$0xff]  }
  0x40   :  { %v813_v26 = vld [vmem:[#allocation7 + $0xcc] ss:$16 sps:$4 sm:$0xff]   ;;  %v815_v27 = vld [vmem:[#allocation7 + $0xc0] ss:$16 sps:$4 sm:$0xff]   ;;  %v816_v28 = vld [vmem:[#allocation7 + $0xc8] ss:$16 sps:$4 sm:$0xff]  }
  0x41   :  { %v817_v29 = vld [vmem:[#allocation7 + $0xe4] ss:$16 sps:$4 sm:$0xff]   ;;  %v819_v30 = vld [vmem:[#allocation7 + $0xec] ss:$16 sps:$4 sm:$0xff]   ;;  %v821_v31 = vld [vmem:[#allocation7 + $0xe0] ss:$16 sps:$4 sm:$0xff]  }
  0x42   :  { %298 = vmatpush1.bf16.msra.mxu0 %v791_v11  ;;  %339 = vmatpush1.bf16.msra.mxu1 %v792_v12  ;;  %v822_v32 = vld [vmem:[#allocation7 + $0xe8] ss:$16 sps:$4 sm:$0xff]   ;;  %v825_v33 = vld [vmem:[#allocation5 + $0x4] ss:$16 sps:$4 sm:$0xff]   ;;  %v828_v34 = vld [vmem:[#allocation5 + $0xc] ss:$16 sps:$4 sm:$0xff]   ;;  %v619_v11 = vlaneseq }
  0x43   :  { %299 = vmatprep.subr.bf16.mxu0 %v793_v13  ;;  %340 = vmatprep.subr.bf16.mxu1 %v795_v14  ;;  %v100_v35 = vld [vmem:[%s1133_s1] sm:$0xf]  ;;  %v823_v36 = vld [vmem:[#allocation5] ss:$16 sps:$4 sm:$0xff]   ;;  %v831_v38 = vld [vmem:[#allocation5 + $0x24] ss:$16 sps:$4 sm:$0xff]  }
  0x44   :  { %v826_v37 = vld [vmem:[#allocation5 + $0x8] ss:$16 sps:$4 sm:$0xff]   ;;  %v834_v39 = vld [vmem:[#allocation5 + $0x2c] ss:$16 sps:$4 sm:$0xff]   ;;  %v829_v40 = vld [vmem:[#allocation5 + $0x20] ss:$16 sps:$4 sm:$0xff]  }
  0x45   :  { %v832_v41 = vld [vmem:[#allocation5 + $0x28] ss:$16 sps:$4 sm:$0xff]   ;;  %v837_v42 = vld [vmem:[#allocation5 + $0x44] ss:$16 sps:$4 sm:$0xff]   ;;  %v840_v43 = vld [vmem:[#allocation5 + $0x4c] ss:$16 sps:$4 sm:$0xff]  }
  0x46   :  { %300 = vmatpush1.bf16.msra.mxu0 %v797_v15  ;;  %341 = vmatpush1.bf16.msra.mxu1 %v798_v16  ;;  %v835_v44 = vld [vmem:[#allocation5 + $0x40] ss:$16 sps:$4 sm:$0xff]   ;;  %v838_v45 = vld [vmem:[#allocation5 + $0x48] ss:$16 sps:$4 sm:$0xff]   ;;  %v843_v46 = vld [vmem:[#allocation5 + $0x64] ss:$16 sps:$4 sm:$0xff]  }
  0x47   :  { %301 = vmatprep.subr.bf16.mxu0 %v799_v17  ;;  %342 = vmatprep.subr.bf16.mxu1 %v801_v18  ;;  %v846_v47 = vld [vmem:[#allocation5 + $0x6c] ss:$16 sps:$4 sm:$0xff]   ;;  %v841_v48 = vld [vmem:[#allocation5 + $0x60] ss:$16 sps:$4 sm:$0xff]   ;;  %v844_v49 = vld [vmem:[#allocation5 + $0x68] ss:$16 sps:$4 sm:$0xff]  }
  0x48   :  { %v849_v50 = vld [vmem:[#allocation5 + $0x84] ss:$16 sps:$4 sm:$0xff]   ;;  %v852_v51 = vld [vmem:[#allocation5 + $0x8c] ss:$16 sps:$4 sm:$0xff]   ;;  %v847_v52 = vld [vmem:[#allocation5 + $0x80] ss:$16 sps:$4 sm:$0xff]  }
  0x49   :  { %v850_v53 = vld [vmem:[#allocation5 + $0x88] ss:$16 sps:$4 sm:$0xff]   ;;  %v855_v54 = vld [vmem:[#allocation5 + $0xa4] ss:$16 sps:$4 sm:$0xff]   ;;  %v858_v55 = vld [vmem:[#allocation5 + $0xac] ss:$16 sps:$4 sm:$0xff]  }
  0x4a   :  { %302 = vmatpush1.bf16.msra.mxu0 %v803_v19  ;;  %343 = vmatpush1.bf16.msra.mxu1 %v804_v20  ;;  %v853_v56 = vld [vmem:[#allocation5 + $0xa0] ss:$16 sps:$4 sm:$0xff]   ;;  %v856_v57 = vld [vmem:[#allocation5 + $0xa8] ss:$16 sps:$4 sm:$0xff]   ;;  %v861_v58 = vld [vmem:[#allocation5 + $0xc4] ss:$16 sps:$4 sm:$0xff]  }
  0x4b   :  { %303 = vmatprep.subr.bf16.mxu0 %v805_v21  ;;  %344 = vmatprep.subr.bf16.mxu1 %v807_v22  ;;  %v864_v59 = vld [vmem:[#allocation5 + $0xcc] ss:$16 sps:$4 sm:$0xff]   ;;  %v859_v60 = vld [vmem:[#allocation5 + $0xc0] ss:$16 sps:$4 sm:$0xff]   ;;  %v862_v61 = vld [vmem:[#allocation5 + $0xc8] ss:$16 sps:$4 sm:$0xff]  }
  0x4c   :  { %v867_v62 = vld [vmem:[#allocation5 + $0xe4] ss:$16 sps:$4 sm:$0xff]   ;;  %v870_v63 = vld [vmem:[#allocation5 + $0xec] ss:$16 sps:$4 sm:$0xff]   ;;  %v868_v1 = vld [vmem:[#allocation5 + $0xe8] ss:$16 sps:$4 sm:$0xff]  }
  0x4d   :  { %v67_v2 = vld [vmem:[%s1132_s0] sm:$0xf]  ;;  %v620_v12 = vshrl.u32 %v619_v11, 7  ;;  %s1011_s0 = smov [#allocation9]  }
  0x4e   :  { %304 = vmatpush1.bf16.msra.mxu0 %v809_v23  ;;  %345 = vmatpush1.bf16.msra.mxu1 %v810_v24  ;;  %v617_v14 = vld [vmem:[%s1137_s5] sm:$0xf]  ;;  %s686_s5 = sshll.u32 %s1011_s0, 4  ;;  %s687_s5 = int_to_ptr.vmem [resolvable:$true] %s686_s5 }
  0x4f   :  { %305 = vmatprep.subr.bf16.mxu0 %v811_v25  ;;  %346 = vmatprep.subr.bf16.mxu1 %v813_v26  ;;  %v621_v13 = vsub.s32 0, %v620_v12  ;;  %v625_v15 = vsub.s32 1, %v620_v12  ;;  %v633_v26 = vsub.s32 3, %v620_v12  ;;  %s953_s18 = scalar_lea.vmem %s687_s5, 128  ;;  %p958_p11 = scmp.lt.s32.totalorder %s687_s5, %s687_s5 }
  0x50   :  { %p954_p10 = scmp.ne.s32.totalorder %s687_s5, %s953_s18  ;;  %p959_p12 = scmp.lt.s32.totalorder %s953_s18, %s953_s18 }
  0x51   :  { %v622_v16 = vrot.slane %v617_v14, %v621_v13  ;;  %v626_v19 = vrot.slane %v617_v14, %v625_v15 }
  0x52   :  { %306 = vmatpush1.bf16.msra.mxu0 %v815_v27  ;;  %347 = vmatpush1.bf16.msra.mxu1 %v816_v28  ;;  %p960_p13 = por %p959_p12, %p958_p11 }
  0x53   :  { %307 = vmatprep.subr.bf16.mxu0 %v817_v29  ;;  %348 = vmatprep.subr.bf16.mxu1 %v819_v30 }
  0x54   :  { %p961_p0 = pnand %p960_p13, %p954_p10 }
  0x56   :  { %308 = vmatpush1.bf16.msra.mxu0 %v821_v31  ;;  %349 = vmatpush1.bf16.msra.mxu1 %v822_v32 }
  0x57   :  { %535 = vmatprep.subr.bf16.mxu0 %v825_v33  ;;  %576 = vmatprep.subr.bf16.mxu1 %v828_v34 }
  0x59   :  { %326 = vmatmul.mubr.bf16.vlgmr.msra.gmra.mrb[0].mxu0 %v100_v35  ;;  %367 = vmatmul.mubr.bf16.vlgmr.msra.gmra.mrb[0].mxu1 %v100_v35  ;;  %v634_v35 = vrot.slane %v617_v14, %v633_v26 }
  0x5a   :  { %536 = vmatpush1.bf16.msra.mxu0 %v823_v36  ;;  %577 = vmatpush1.bf16.msra.mxu1 %v826_v37  ;;  %v629_v36 = vsub.s32 2, %v620_v12 }
  0x5b   :  { %537 = vmatprep.subr.bf16.mxu0 %v831_v38  ;;  %578 = vmatprep.subr.bf16.mxu1 %v834_v39 }
  0x5c   :  { %567 = vmatprep.mubr.bf16.mxu0 %v1010_v0  ;;  %608 = vmatprep.mubr.bf16.mxu1 %v1010_v0  ;;  %v865_v0 = vld [vmem:[#allocation5 + $0xe0] ss:$16 sps:$4 sm:$0xff]   ;;  %v630_v38 = vrot.slane %v617_v14, %v629_v36 }
  0x5e   :  { %538 = vmatpush1.bf16.msra.mxu0 %v829_v40  ;;  %579 = vmatpush1.bf16.msra.mxu1 %v832_v41 }
  0x5f   :  { %539 = vmatprep.subr.bf16.mxu0 %v837_v42  ;;  %580 = vmatprep.subr.bf16.mxu1 %v840_v43 }
  0x62   :  { %540 = vmatpush1.bf16.msra.mxu0 %v835_v44  ;;  %581 = vmatpush1.bf16.msra.mxu1 %v838_v45 }
  0x63   :  { %541 = vmatprep.subr.bf16.mxu0 %v843_v46  ;;  %582 = vmatprep.subr.bf16.mxu1 %v846_v47  ;;  %v662_v47 = vld [vmem:[#allocation2] sm:$0xff] }
  0x66   :  { %542 = vmatpush1.bf16.msra.mxu0 %v841_v48  ;;  %583 = vmatpush1.bf16.msra.mxu1 %v844_v49 }
  0x67   :  { %543 = vmatprep.subr.bf16.mxu0 %v849_v50  ;;  %584 = vmatprep.subr.bf16.mxu1 %v852_v51 }
  0x6a   :  { %544 = vmatpush1.bf16.msra.mxu0 %v847_v52  ;;  %585 = vmatpush1.bf16.msra.mxu1 %v850_v53 }
  0x6b   :  { %545 = vmatprep.subr.bf16.mxu0 %v855_v54  ;;  %586 = vmatprep.subr.bf16.mxu1 %v858_v55 }
  0x6e   :  { %546 = vmatpush1.bf16.msra.mxu0 %v853_v56  ;;  %587 = vmatpush1.bf16.msra.mxu1 %v856_v57 }
  0x6f   :  { %547 = vmatprep.subr.bf16.mxu0 %v861_v58  ;;  %588 = vmatprep.subr.bf16.mxu1 %v864_v59 }
  0x72   :  { %548 = vmatpush1.bf16.msra.mxu0 %v859_v60  ;;  %589 = vmatpush1.bf16.msra.mxu1 %v862_v61 }
  0x73   :  { %549 = vmatprep.subr.bf16.mxu0 %v867_v62  ;;  %590 = vmatprep.subr.bf16.mxu1 %v870_v63 }
  0x76   :  { %550 = vmatpush1.bf16.msra.mxu0 %v865_v0  ;;  %591 = vmatpush1.bf16.msra.mxu1 %v868_v1 }
  0x79   :  { %568 = vmatmul.mubr.bf16.vlgmr.msra.gmra.mrb[4].mxu0 %v67_v2  ;;  %609 = vmatmul.mubr.bf16.vlgmr.msra.gmra.mrb[4].mxu1 %v67_v2 }
 0x12c   :  { %v327_v3 = vpop.f32.mrb[0].mxu0  ;;  %v368_v4 = vpop.f32.mrb[0].mxu1 }
 0x12d   :  { %v329_v5 = vpop.f32.mrb[1].mxu0  ;;  %v370_v6 = vpop.f32.mrb[1].mxu1 }
 0x12e   :  { %v331_v7 = vpop.f32.mrb[2].mxu0  ;;  %v372_v8 = vpop.f32.mrb[2].mxu1 }
 0x12f   :  { %v332_v9 = vpop.f32.mrb[3].mxu0  ;;  %v373_v10 = vpop.f32.mrb[3].mxu1 }
 0x14c   :  { %v569_v17 = vpop.f32.mrb[4].mxu0  ;;  %v610_v18 = vpop.f32.mrb[4].mxu1 }
 0x14d   :  { %v570_v20 = vadd.f32 %v569_v17, %v327_v3  ;;  %v611_v21 = vadd.f32 %v610_v18, %v368_v4  ;;  %v571_v22 = vpop.f32.mrb[5].mxu0  ;;  %v612_v23 = vpop.f32.mrb[5].mxu1 }
 0x14e   :  { %v572_v24 = vadd.f32 %v571_v22, %v329_v5  ;;  %v613_v25 = vadd.f32 %v612_v23, %v370_v6  ;;  %v573_v27 = vpop.f32.mrb[6].mxu0  ;;  %v614_v28 = vpop.f32.mrb[6].mxu1 }
 0x14f   :  { %v639_v29 = vadd.f32 %v622_v16, %v570_v20  ;;  %v574_v30 = vpop.f32.mrb[7].mxu0  ;;  %v615_v31 = vpop.f32.mrb[7].mxu1  ;;  %v641_v40 = vadd.f32 %v630_v38, %v611_v21 }
 0x150   :  { %v640_v32 = vadd.f32 %v626_v19, %v572_v24  ;;  %v642_v37 = vadd.f32 %v634_v35, %v613_v25 }
 0x151   :  { %v764_v33 = vmul.f32 -1.442695, %v639_v29 }
 0x152   :  { %v765_v34 = vmul.f32 -1.442695, %v640_v32  ;;  %v766_v39 = vmul.f32 -1.442695, %v642_v37 }
 0x153   :  { %871 = vpow2.f32 %v764_v33 }
 0x154   :  { %873 = vpow2.f32 %v765_v34 }
 0x155   :  { %875 = vpow2.f32 %v766_v39 }
 0x156   :  { %877 = vtanh.f32 %v641_v40 }
 0x15d   :  { %v872_v41 = vpop.eup %871 }
 0x15e   :  { %v874_v42 = vpop.eup %873  ;;  %v646_v43 = vadd.f32 1.0, %v872_v41 }
 0x15f   :  { %v652_v44 = vadd.f32 1.0, %v874_v42  ;;  %v876_v45 = vpop.eup %875 }
 0x160   :  { %879 = vrcp.f32 %v646_v43  ;;  %v878_v46 = vpop.eup %877  ;;  %v659_v51 = vadd.f32 1.0, %v876_v45 }
 0x161   :  { %881 = vrcp.f32 %v652_v44 }
 0x162   :  { %883 = vrcp.f32 %v659_v51 }
 0x16a   :  { %v880_v48 = vpop.eup %879 }
 0x16b   :  { %v882_v49 = vpop.eup %881  ;;  %v664_v50 = vmul.f32 %v880_v48, %v878_v46 }
 0x16c   :  { %v663_v52 = vmul.f32 %v882_v49, %v662_v47 }
 0x16e   :  { %v665_v53 = vadd.f32 %v664_v50, %v663_v52 }
 0x170   :  { %885 = vtanh.f32 %v665_v53  ;;  %668 = vst [vmem:[#allocation9] sm:$0xff] %v665_v53 }
 0x171   :  { %964 = shalt.err (!%p961_p0)
}
 0x172   :  { %s965_s21 = scalar_lea.hbm %s1139_s7, 128 }
 0x173   :  { %p966_p1 = scmp.ne.s32.totalorder %s1139_s7, %s965_s21  ;;  %p969_p2 = scmp.lt.u32.totalorder %s965_s21, %s1139_s7 }
 0x175   :  { %p971_p3 = pnand %p969_p2, %p966_p1 }
 0x177   :  { %974 = shalt.err (!%p971_p3)
}
 0x178   :  { %689 = dma.vmem_to_hbm [thread:$0]  %s687_s5, 128, %s1139_s7, [#allocation10]   ;;  %v884_v54 = vpop.eup %883 }
 0x179   :  { %s1012_s27 = smov [#allocation8]  }
 0x17a   :  { %s676_s28 = sshll.u32 %s1012_s27, 4  ;;  %v886_v55 = vpop.eup %885  ;;  %s677_s28 = int_to_ptr.vmem [resolvable:$true] %s676_s28 }
 0x17b   :  { %v667_v56 = vmul.f32 %v886_v55, %v884_v54  ;;  %s975_s29 = scalar_lea.vmem %s677_s28, 128  ;;  %p980_p5 = scmp.lt.s32.totalorder %s677_s28, %s677_s28 }
 0x17c   :  { %p976_p4 = scmp.ne.s32.totalorder %s677_s28, %s975_s29  ;;  %p981_p6 = scmp.lt.s32.totalorder %s975_s29, %s975_s29 }
 0x17d   :  { %669 = vst [vmem:[#allocation8] sm:$0xff] %v667_v56 }
 0x17e   :  { %p982_p7 = por %p981_p6, %p980_p5 }
 0x180   :  { %p983_p8 = pnand %p982_p7, %p976_p4 }
 0x182   :  { %986 = shalt.err (!%p983_p8)
}
 0x183   :  { %s987_s9 = scalar_lea.hbm %s1138_s6, 128 }
 0x184   :  { %p988_p9 = scmp.ne.s32.totalorder %s1138_s6, %s987_s9  ;;  %p991_p10 = scmp.lt.u32.totalorder %s987_s9, %s1138_s6 }
 0x186   :  { %p993_p11 = pnand %p991_p10, %p988_p9 }
 0x188   :  { %996 = shalt.err (!%p993_p11)
}
 0x189   :  { %679 = dma.vmem_to_hbm [thread:$0]  %s677_s28, 128, %s1138_s6, [#allocation4]  }
 0x18a   :  { %1001 = dma.done.wait [#allocation4], 128  }
 0x18b   :  { %1002 = vsyncadd [#allocation4], 4294967168 }
 0x18c   :  { %1003 = dma.done.wait [#allocation10], 128  }
 0x18d   :  { %1004 = vsyncadd [#allocation10], 4294967168 }
 0x18e   :  { %696 = vsyncpa [#allocation3], 1 }
 0x18f   :  { %697 = vsyncpa [#allocation6], 1 }
 0x190   :  { %698 = vsyncpa [#allocation4], 1 }
 0x191   :  { %699 = vsyncpa [#allocation10], 1 }

</bundles_post_ra>
